<compile_context>
chip_gen: v7x
topology: tpu7x:2x2x1
jax: 0.10.0
libtpu: 0.0.40
codegen_flags: <defaults>
</compile_context>

<pallas_src>
import functools
import math

import jax
import jax.numpy as jnp
from jax.experimental import pallas as pl
from jax.experimental.pallas import tpu as pltpu


def _round_up(n: int, m: int) -> int:
    return ((n + m - 1) // m) * m


def _vmem_capacity_bytes() -> int:
    try:
        info = pltpu.get_tpu_info()
        cap = getattr(info, "vmem_capacity_bytes", None)
        if cap:
            return int(cap)
    except Exception:
        pass
    return 64 * 1024 * 1024  # conservative (v7x per-TC physical VMEM)


def _supports_bf16_eup() -> bool:
    # v6e / v7x have bf16 EUP+VPU; v5e and older do not -> keep f32 tanh there.
    try:
        kind = jax.devices()[0].device_kind.lower()
    except Exception:
        return False
    return not any(tag in kind for tag in ("v2", "v3", "v4", "v5"))


def _choose_tk(Hp: int, NHp: int, budget_bytes: int) -> int:
    """Largest tk (multiple of 128, dividing Hp) whose W1 block fits the budget."""
    for cand in range(Hp, 0, -128):
        if Hp % cand == 0 and cand * NHp * 2 <= budget_bytes:
            return cand
    return 128


# --------------------------------------------------------------------------
# Fused NSP head kernel with optional K (input-feature) tiling:
#   acc += X_k @ W1_k            (MXU, bf16 operands, f32 accumulation)
#   on last k: h = tanh(acc+b1); out = h @ W2 + b2   (lane-dense bf16 store)
#   x_ref : (tm, tk)   native dtype (cast in-kernel)
#   w1_ref: (tk, NHp)  bf16      b1_ref: (1, NHp) f32
#   w2_ref: (NHp, Np)  bf16      b2_ref: (1, Np)  f32
#   o_ref : (tm, Np)   bf16      acc_ref: (tm, NHp) f32 scratch
# --------------------------------------------------------------------------
def nsp_kernel(x_ref, w1_ref, b1_ref, w2_ref, b2_ref, o_ref, acc_ref, *, tanh_bf16):
    k = pl.program_id(1)

    @pl.when(k == 0)
    def _():
        acc_ref[...] = jnp.zeros_like(acc_ref)

    acc_ref[...] += jnp.dot(x_ref[...].astype(jnp.bfloat16), w1_ref[...],
                            preferred_element_type=jnp.float32)

    @pl.when(k == pl.num_programs(1) - 1)
    def _():
        h = acc_ref[...] + b1_ref[...]
        if tanh_bf16:
            h = jnp.tanh(h.astype(jnp.bfloat16))          # bf16 EUP (v6e/v7x)
        else:
            h = jnp.tanh(h).astype(jnp.bfloat16)          # f32 EUP (v5e)
        o_ref[...] = (jnp.dot(h, w2_ref[...], preferred_element_type=jnp.float32)
                      + b2_ref[...]).astype(o_ref.dtype)


# --------------------------------------------------------------------------
# One-time parameter preparation (pad + cast weights once, reuse every call).
# --------------------------------------------------------------------------
def prepare_nsp_params(params):
    w1 = jnp.asarray(params['w1']); b1 = jnp.asarray(params['b1'])
    w2 = jnp.asarray(params['w2']); b2 = jnp.asarray(params['b2'])
    H, NH = w1.shape
    NOUT = w2.shape[1]
    Hp, NHp, Np = _round_up(H, 128), _round_up(NH, 128), _round_up(NOUT, 128)
    return {
        'H': H, 'NH': NH, 'NOUT': NOUT, 'Hp': Hp, 'NHp': NHp, 'Np': Np,
        'w1': jnp.pad(w1.astype(jnp.bfloat16), ((0, Hp - H), (0, NHp - NH))),
        'b1': jnp.pad(b1.astype(jnp.float32).reshape(1, NH), ((0, 0), (0, NHp - NH))),
        'w2': jnp.pad(w2.astype(jnp.bfloat16), ((0, NHp - NH), (0, Np - NOUT))),
        'b2': jnp.pad(b2.astype(jnp.float32).reshape(1, NOUT), ((0, 0), (0, Np - NOUT))),
    }


# --------------------------------------------------------------------------
# Forward pass with prepared params.
# --------------------------------------------------------------------------
def nsp_forward(prep, x, *, row_tile=512):
    H, NOUT = prep['H'], prep['NOUT']
    Hp, NHp, Np = prep['Hp'], prep['NHp'], prep['Np']
    w1p, b1p, w2p, b2p = prep['w1'], prep['b1'], prep['w2'], prep['b2']

    lead = x.shape[:-1]
    M = int(math.prod(lead)) if lead else 1
    x2 = x.reshape(M, H)

    # Row tiling: >=2 (even) grid steps so both v7x TensorCores are used; tm is a
    # multiple of 16 (bf16 sublane packing after the in-kernel cast).
    n_rows = max(2, -(-M // row_tile))
    if n_rows % 2:
        n_rows += 1
    tm = _round_up(max(-(-M // n_rows), 1), 16)
    n_rows = max(2, -(-M // tm))
    if n_rows % 2:
        n_rows += 1
    Mp = tm * n_rows

    cap = _vmem_capacity_bytes()
    tk = _choose_tk(Hp, NHp, cap // 4)      # K-tile W1 only when it would hog VMEM
    nk = Hp // tk

    # Pad X only when needed (rows to Mp, features to Hp); keep the native dtype.
    if (Mp, Hp) != (M, H):
        x2 = jnp.pad(x2, ((0, Mp - M), (0, Hp - H)))

    xbytes = x2.dtype.itemsize
    need = (2 * tm * tk * xbytes                          # X tiles (double-buffered)
            + (2 if nk > 1 else 1) * tk * NHp * 2         # W1 block(s)
            + NHp * 4 + NHp * Np * 2 + Np * 4             # b1, W2, b2 (resident)
            + 2 * tm * Np * 2                             # bf16 output tiles
            + tm * NHp * 4 + tm * NHp * 2)                # f32 acc + bf16 h temp
    vmem_limit = int(min(max(int(need * 1.5), 16 * 1024 * 1024), int(cap * 0.9)))

    kernel = functools.partial(nsp_kernel, tanh_bf16=_supports_bf16_eup())

    def run(single_buffer_consts: bool):
        def const_spec(shape):
            if single_buffer_consts:
                return pl.BlockSpec(shape, lambda i, k: (0, 0),
                                    pipeline_mode=pl.Buffered(1))
            return pl.BlockSpec(shape, lambda i, k: (0, 0))

        w1_spec = (const_spec((tk, NHp)) if nk == 1
                   else pl.BlockSpec((tk, NHp), lambda i, k: (k, 0)))

        return pl.pallas_call(
            kernel,
            grid=(n_rows, nk),                       # reduction axis (k) last
            in_specs=[
                pl.BlockSpec((tm, tk), lambda i, k: (i, k)),   # streamed X tiles
                w1_spec,
                const_spec((1, NHp)),                          # b1
                const_spec((NHp, Np)),                         # W2
                const_spec((1, Np)),                           # b2
            ],
            out_specs=pl.BlockSpec((tm, Np), lambda i, k: (i, 0)),
            out_shape=jax.ShapeDtypeStruct((Mp, Np), jnp.bfloat16),
            scratch_shapes=[pltpu.VMEM((tm, NHp), jnp.float32)],
            compiler_params=pltpu.CompilerParams(
                dimension_semantics=("parallel", "arbitrary"),
                vmem_limit_bytes=vmem_limit),
        )(x2, w1p, b1p, w2p, b2p)

    try:
        out_padded = run(True)
    except Exception:
        # Fallback if single-buffering constants is unsupported on this jax build.
        out_padded = run(False)

    out = out_padded[:M, :NOUT].astype(x.dtype)
    return out.reshape(*lead, NOUT)


def next_sentence_prediction(params, x, **kwargs):
    """Convenience path: prepare params then run (prefer caching prepare_nsp_params)."""
    return nsp_forward(prepare_nsp_params(params), x, **kwargs)


# --------------------------------------------------------------------------
# Deterministic synthetic parameters + pure-JAX reference
# --------------------------------------------------------------------------
def init_nsp_params(key, num_inputs, num_hiddens):
    k1, k2, k3, k4 = jax.random.split(key, 4)
    return {
        'w1': (0.02 * jax.random.normal(k1, (num_inputs, num_hiddens))).astype(jnp.float32),
        'b1': (0.02 * jax.random.normal(k2, (num_hiddens,))).astype(jnp.float32),
        'w2': (0.02 * jax.random.normal(k3, (num_hiddens, 2))).astype(jnp.float32),
        'b2': (0.02 * jax.random.normal(k4, (2,))).astype(jnp.float32),
    }


def nsp_reference(params, x):
    h = jnp.tanh(x @ params['w1'] + params['b1'])
    return h @ params['w2'] + params['b2']


if __name__ == "__main__":
    # small shapes consistent with the module: batch=2, hidden=32
    B, H, NUM_HIDDENS = 2, 32, 32

    key = jax.random.PRNGKey(0)
    k_x, k_p = jax.random.split(key)

    params = init_nsp_params(k_p, H, NUM_HIDDENS)
    x = jax.random.normal(k_x, (B, H), dtype=jnp.float32)

    prep = prepare_nsp_params(params)          # pad/cast weights once, reuse
    out = nsp_forward(prep, x)
    out = jax.block_until_ready(out)

    ref = nsp_reference(params, x)
    assert out.shape == (B, 2)
    assert jnp.allclose(out, ref, atol=2e-2, rtol=2e-2), float(jnp.max(jnp.abs(out - ref)))
    print("KERNEL_OK")
</pallas_src>

<mosaic_0001>
module attributes {stable_mosaic.version = 11 : i64} {
  func.func @nsp_kernel(%arg0: i32, %arg1: i32, %arg2: memref<16x128xf32, #tpu.memory_space<vmem>>, %arg3: memref<128x128xbf16, #tpu.memory_space<vmem>>, %arg4: memref<1x128xf32, #tpu.memory_space<vmem>>, %arg5: memref<128x128xbf16, #tpu.memory_space<vmem>>, %arg6: memref<1x128xf32, #tpu.memory_space<vmem>>, %arg7: memref<16x128xbf16, #tpu.memory_space<vmem>>, %arg8: memref<16x128xf32, #tpu.memory_space<vmem>>) attributes {dimension_semantics = [#tpu.dimension_semantics<parallel>, #tpu.dimension_semantics<arbitrary>], iteration_bounds = array<i64: 2, 1>, scalar_prefetch = 0 : i64, scratch_operands = 1 : i64, tpu.core_type = #tpu.core_type<tc>, window_params = [{transform_indices = @transform_0, window_bounds = array<i64: 16, 128>}, {pipeline_mode = #tpu.pipeline_mode<synchronous>, transform_indices = @transform_1, window_bounds = array<i64: 128, 128>}, {pipeline_mode = #tpu.pipeline_mode<synchronous>, transform_indices = @transform_2, window_bounds = array<i64: 1, 128>}, {pipeline_mode = #tpu.pipeline_mode<synchronous>, transform_indices = @transform_3, window_bounds = array<i64: 128, 128>}, {pipeline_mode = #tpu.pipeline_mode<synchronous>, transform_indices = @transform_4, window_bounds = array<i64: 1, 128>}, {transform_indices = @transform_5, window_bounds = array<i64: 16, 128>}]} {
    %c0_i32 = arith.constant 0 : i32
    %0 = arith.cmpi eq, %arg1, %c0_i32 : i32
    %1 = arith.extui %0 : i1 to i32
    %c0_i32_0 = arith.constant 0 : i32
    %2 = arith.cmpi ne, %1, %c0_i32_0 : i32
    scf.if %2 {
      %cst_10 = arith.constant 0.000000e+00 : f32
      %13 = vector.broadcast %cst_10 : f32 to vector<16x128xf32>
      %c0_11 = arith.constant 0 : index
      %c0_12 = arith.constant 0 : index
      %14 = vector.load %arg8[%c0_11, %c0_12] : memref<16x128xf32, #tpu.memory_space<vmem>>, vector<16x128xf32>
      tpu.vector_store %arg8[%c0_11, %c0_12], %13 {strides = array<i32>} : memref<16x128xf32, #tpu.memory_space<vmem>>, vector<16x128xf32>,
    } else {
    }
    %c0 = arith.constant 0 : index
    %c0_1 = arith.constant 0 : index
    %3 = vector.load %arg8[%c0, %c0_1] : memref<16x128xf32, #tpu.memory_space<vmem>>, vector<16x128xf32>
    %c0_2 = arith.constant 0 : index
    %c0_3 = arith.constant 0 : index
    %4 = vector.load %arg2[%c0_2, %c0_3] : memref<16x128xf32, #tpu.memory_space<vmem>>, vector<16x128xf32>
    %5 = arith.truncf %4 : vector<16x128xf32> to vector<16x128xbf16>
    %c0_4 = arith.constant 0 : index
    %c0_5 = arith.constant 0 : index
    %6 = vector.load %arg3[%c0_4, %c0_5] : memref<128x128xbf16, #tpu.memory_space<vmem>>, vector<128x128xbf16>
    %cst = arith.constant dense<0.000000e+00> : vector<16x128xf32>
    %7 = tpu.matmul %5, %6, %cst {dimension_numbers = #tpu.dot_dimension_numbers<[1], [0], [0], [1], [0, 0, 1, 1], [], []>} : vector<16x128xbf16>, vector<128x128xbf16>, vector<16x128xf32> -> vector<16x128xf32>
    %8 = arith.addf %3, %7 : vector<16x128xf32>
    %c0_6 = arith.constant 0 : index
    %c0_7 = arith.constant 0 : index
    %9 = vector.load %arg8[%c0_6, %c0_7] : memref<16x128xf32, #tpu.memory_space<vmem>>, vector<16x128xf32>
    tpu.vector_store %arg8[%c0_6, %c0_7], %8 {strides = array<i32>} : memref<16x128xf32, #tpu.memory_space<vmem>>, vector<16x128xf32>,
    %c0_i32_8 = arith.constant 0 : i32
    %10 = arith.cmpi eq, %arg1, %c0_i32_8 : i32
    %11 = arith.extui %10 : i1 to i32
    %c0_i32_9 = arith.constant 0 : i32
    %12 = arith.cmpi ne, %11, %c0_i32_9 : i32
    scf.if %12 {
      %c0_10 = arith.constant 0 : index
      %c0_11 = arith.constant 0 : index
      %13 = vector.load %arg8[%c0_10, %c0_11] : memref<16x128xf32, #tpu.memory_space<vmem>>, vector<16x128xf32>
      %c0_12 = arith.constant 0 : index
      %c0_13 = arith.constant 0 : index
      %14 = vector.load %arg4[%c0_12, %c0_13] : memref<1x128xf32, #tpu.memory_space<vmem>>, vector<1x128xf32>
      %15 = vector.broadcast %14 : vector<1x128xf32> to vector<16x128xf32>
      %16 = arith.addf %13, %15 : vector<16x128xf32>
      %17 = arith.truncf %16 : vector<16x128xf32> to vector<16x128xbf16>
      %18 = math.tanh %17 : vector<16x128xbf16>
      %c0_14 = arith.constant 0 : index
      %c0_15 = arith.constant 0 : index
      %19 = vector.load %arg5[%c0_14, %c0_15] : memref<128x128xbf16, #tpu.memory_space<vmem>>, vector<128x128xbf16>
      %cst_16 = arith.constant dense<0.000000e+00> : vector<16x128xf32>
      %20 = tpu.matmul %18, %19, %cst_16 {dimension_numbers = #tpu.dot_dimension_numbers<[1], [0], [0], [1], [0, 0, 1, 1], [], []>} : vector<16x128xbf16>, vector<128x128xbf16>, vector<16x128xf32> -> vector<16x128xf32>
      %c0_17 = arith.constant 0 : index
      %c0_18 = arith.constant 0 : index
      %21 = vector.load %arg6[%c0_17, %c0_18] : memref<1x128xf32, #tpu.memory_space<vmem>>, vector<1x128xf32>
      %22 = vector.broadcast %21 : vector<1x128xf32> to vector<16x128xf32>
      %23 = arith.addf %20, %22 : vector<16x128xf32>
      %24 = arith.truncf %23 : vector<16x128xf32> to vector<16x128xbf16>
      %c0_19 = arith.constant 0 : index
      %c0_20 = arith.constant 0 : index
      %25 = vector.load %arg7[%c0_19, %c0_20] : memref<16x128xbf16, #tpu.memory_space<vmem>>, vector<16x128xbf16>
      tpu.vector_store %arg7[%c0_19, %c0_20], %24 {strides = array<i32>} : memref<16x128xbf16, #tpu.memory_space<vmem>>, vector<16x128xbf16>,
    } else {
    }
    return
  }
  func.func @transform_0(%arg0: i32, %arg1: i32) -> (i32, i32) {
    %c0_i32 = arith.constant 0 : i32
    return %arg0, %arg1 : i32, i32
  }
  func.func @transform_1(%arg0: i32, %arg1: i32) -> (i32, i32) {
    %c0_i32 = arith.constant 0 : i32
    %c0_i32_0 = arith.constant 0 : i32
    %c0_i32_1 = arith.constant 0 : i32
    return %c0_i32, %c0_i32_0 : i32, i32
  }
  func.func @transform_2(%arg0: i32, %arg1: i32) -> (i32, i32) {
    %c0_i32 = arith.constant 0 : i32
    %c0_i32_0 = arith.constant 0 : i32
    %c0_i32_1 = arith.constant 0 : i32
    return %c0_i32, %c0_i32_0 : i32, i32
  }
  func.func @transform_3(%arg0: i32, %arg1: i32) -> (i32, i32) {
    %c0_i32 = arith.constant 0 : i32
    %c0_i32_0 = arith.constant 0 : i32
    %c0_i32_1 = arith.constant 0 : i32
    return %c0_i32, %c0_i32_0 : i32, i32
  }
  func.func @transform_4(%arg0: i32, %arg1: i32) -> (i32, i32) {
    %c0_i32 = arith.constant 0 : i32
    %c0_i32_0 = arith.constant 0 : i32
    %c0_i32_1 = arith.constant 0 : i32
    return %c0_i32, %c0_i32_0 : i32, i32
  }
  func.func @transform_5(%arg0: i32, %arg1: i32) -> (i32, i32) {
    %c0_i32 = arith.constant 0 : i32
    %c0_i32_0 = arith.constant 0 : i32
    return %arg0, %c0_i32 : i32, i32
  }
}

module attributes {stable_mosaic.version = 11 : i64} {
  func.func @nsp_kernel(%arg0: i32, %arg1: i32, %arg2: memref<16x128xf32, #tpu.memory_space<vmem>>, %arg3: memref<128x128xbf16, #tpu.memory_space<vmem>>, %arg4: memref<1x128xf32, #tpu.memory_space<vmem>>, %arg5: memref<128x128xbf16, #tpu.memory_space<vmem>>, %arg6: memref<1x128xf32, #tpu.memory_space<vmem>>, %arg7: memref<16x128xbf16, #tpu.memory_space<vmem>>, %arg8: memref<16x128xf32, #tpu.memory_space<vmem>>) attributes {dimension_semantics = [#tpu.dimension_semantics<parallel>, #tpu.dimension_semantics<arbitrary>], iteration_bounds = array<i64: 2, 1>, scalar_prefetch = 0 : i64, scratch_operands = 1 : i64, tpu.core_type = #tpu.core_type<tc>, window_params = [{transform_indices = @transform_0, window_bounds = array<i64: 16, 128>}, {pipeline_mode = #tpu.pipeline_mode<synchronous>, transform_indices = @transform_1, window_bounds = array<i64: 128, 128>}, {pipeline_mode = #tpu.pipeline_mode<synchronous>, transform_indices = @transform_2, window_bounds = array<i64: 1, 128>}, {pipeline_mode = #tpu.pipeline_mode<synchronous>, transform_indices = @transform_3, window_bounds = array<i64: 128, 128>}, {pipeline_mode = #tpu.pipeline_mode<synchronous>, transform_indices = @transform_4, window_bounds = array<i64: 1, 128>}, {transform_indices = @transform_5, window_bounds = array<i64: 16, 128>}]} {
    %c0_i32 = arith.constant 0 : i32
    %0 = arith.cmpi eq, %arg1, %c0_i32 : i32
    %1 = arith.extui %0 : i1 to i32
    %c0_i32_0 = arith.constant 0 : i32
    %2 = arith.cmpi ne, %1, %c0_i32_0 : i32
    scf.if %2 {
      %cst_10 = arith.constant 0.000000e+00 : f32
      %13 = vector.broadcast %cst_10 : f32 to vector<16x128xf32>
      %c0_11 = arith.constant 0 : index
      %c0_12 = arith.constant 0 : index
      %14 = vector.load %arg8[%c0_11, %c0_12] : memref<16x128xf32, #tpu.memory_space<vmem>>, vector<16x128xf32>
      tpu.vector_store %arg8[%c0_11, %c0_12], %13 {strides = array<i32>} : memref<16x128xf32, #tpu.memory_space<vmem>>, vector<16x128xf32>,
    } else {
    }
    %c0 = arith.constant 0 : index
    %c0_1 = arith.constant 0 : index
    %3 = vector.load %arg8[%c0, %c0_1] : memref<16x128xf32, #tpu.memory_space<vmem>>, vector<16x128xf32>
    %c0_2 = arith.constant 0 : index
    %c0_3 = arith.constant 0 : index
    %4 = vector.load %arg2[%c0_2, %c0_3] : memref<16x128xf32, #tpu.memory_space<vmem>>, vector<16x128xf32>
    %5 = arith.truncf %4 : vector<16x128xf32> to vector<16x128xbf16>
    %c0_4 = arith.constant 0 : index
    %c0_5 = arith.constant 0 : index
    %6 = vector.load %arg3[%c0_4, %c0_5] : memref<128x128xbf16, #tpu.memory_space<vmem>>, vector<128x128xbf16>
    %cst = arith.constant dense<0.000000e+00> : vector<16x128xf32>
    %7 = tpu.matmul %5, %6, %cst {dimension_numbers = #tpu.dot_dimension_numbers<[1], [0], [0], [1], [0, 0, 1, 1], [], []>} : vector<16x128xbf16>, vector<128x128xbf16>, vector<16x128xf32> -> vector<16x128xf32>
    %8 = arith.addf %3, %7 : vector<16x128xf32>
    %c0_6 = arith.constant 0 : index
    %c0_7 = arith.constant 0 : index
    %9 = vector.load %arg8[%c0_6, %c0_7] : memref<16x128xf32, #tpu.memory_space<vmem>>, vector<16x128xf32>
    tpu.vector_store %arg8[%c0_6, %c0_7], %8 {strides = array<i32>} : memref<16x128xf32, #tpu.memory_space<vmem>>, vector<16x128xf32>,
    %c0_i32_8 = arith.constant 0 : i32
    %10 = arith.cmpi eq, %arg1, %c0_i32_8 : i32
    %11 = arith.extui %10 : i1 to i32
    %c0_i32_9 = arith.constant 0 : i32
    %12 = arith.cmpi ne, %11, %c0_i32_9 : i32
    scf.if %12 {
      %c0_10 = arith.constant 0 : index
      %c0_11 = arith.constant 0 : index
      %13 = vector.load %arg8[%c0_10, %c0_11] : memref<16x128xf32, #tpu.memory_space<vmem>>, vector<16x128xf32>
      %c0_12 = arith.constant 0 : index
      %c0_13 = arith.constant 0 : index
      %14 = vector.load %arg4[%c0_12, %c0_13] : memref<1x128xf32, #tpu.memory_space<vmem>>, vector<1x128xf32>
      %15 = vector.broadcast %14 : vector<1x128xf32> to vector<16x128xf32>
      %16 = arith.addf %13, %15 : vector<16x128xf32>
      %17 = arith.truncf %16 : vector<16x128xf32> to vector<16x128xbf16>
      %18 = math.tanh %17 : vector<16x128xbf16>
      %c0_14 = arith.constant 0 : index
      %c0_15 = arith.constant 0 : index
      %19 = vector.load %arg5[%c0_14, %c0_15] : memref<128x128xbf16, #tpu.memory_space<vmem>>, vector<128x128xbf16>
      %cst_16 = arith.constant dense<0.000000e+00> : vector<16x128xf32>
      %20 = tpu.matmul %18, %19, %cst_16 {dimension_numbers = #tpu.dot_dimension_numbers<[1], [0], [0], [1], [0, 0, 1, 1], [], []>} : vector<16x128xbf16>, vector<128x128xbf16>, vector<16x128xf32> -> vector<16x128xf32>
      %c0_17 = arith.constant 0 : index
      %c0_18 = arith.constant 0 : index
      %21 = vector.load %arg6[%c0_17, %c0_18] : memref<1x128xf32, #tpu.memory_space<vmem>>, vector<1x128xf32>
      %22 = vector.broadcast %21 : vector<1x128xf32> to vector<16x128xf32>
      %23 = arith.addf %20, %22 : vector<16x128xf32>
      %24 = arith.truncf %23 : vector<16x128xf32> to vector<16x128xbf16>
      %c0_19 = arith.constant 0 : index
      %c0_20 = arith.constant 0 : index
      %25 = vector.load %arg7[%c0_19, %c0_20] : memref<16x128xbf16, #tpu.memory_space<vmem>>, vector<16x128xbf16>
      tpu.vector_store %arg7[%c0_19, %c0_20], %24 {strides = array<i32>} : memref<16x128xbf16, #tpu.memory_space<vmem>>, vector<16x128xbf16>,
    } else {
    }
    return
  }
  func.func @transform_0(%arg0: i32, %arg1: i32) -> (i32, i32) {
    %c0_i32 = arith.constant 0 : i32
    return %arg0, %arg1 : i32, i32
  }
  func.func @transform_1(%arg0: i32, %arg1: i32) -> (i32, i32) {
    %c0_i32 = arith.constant 0 : i32
    %c0_i32_0 = arith.constant 0 : i32
    %c0_i32_1 = arith.constant 0 : i32
    return %c0_i32, %c0_i32_0 : i32, i32
  }
  func.func @transform_2(%arg0: i32, %arg1: i32) -> (i32, i32) {
    %c0_i32 = arith.constant 0 : i32
    %c0_i32_0 = arith.constant 0 : i32
    %c0_i32_1 = arith.constant 0 : i32
    return %c0_i32, %c0_i32_0 : i32, i32
  }
  func.func @transform_3(%arg0: i32, %arg1: i32) -> (i32, i32) {
    %c0_i32 = arith.constant 0 : i32
    %c0_i32_0 = arith.constant 0 : i32
    %c0_i32_1 = arith.constant 0 : i32
    return %c0_i32, %c0_i32_0 : i32, i32
  }
  func.func @transform_4(%arg0: i32, %arg1: i32) -> (i32, i32) {
    %c0_i32 = arith.constant 0 : i32
    %c0_i32_0 = arith.constant 0 : i32
    %c0_i32_1 = arith.constant 0 : i32
    return %c0_i32, %c0_i32_0 : i32, i32
  }
  func.func @transform_5(%arg0: i32, %arg1: i32) -> (i32, i32) {
    %c0_i32 = arith.constant 0 : i32
    %c0_i32_0 = arith.constant 0 : i32
    return %arg0, %c0_i32 : i32, i32
  }
}

</mosaic_0001>

<bundles_post_ra>
// kernel: tpu_custom_call.1
= control target key start
LH: loop header
LB: loop body
LE: loop exit
PB: predicated region body
PF: predicated region fallthrough
CT: control target
= control target key end

     0   :  { %10 = vsyncpa [#allocation4], 0  ;;  %s1361_s0 = inlined_call_operand.hbm [shape: f32[32,128], index: 0, kind: input, shape index: {}]   ;;  %s1362_s1 = inlined_call_operand.hbm [shape: bf16[128,128], index: 1, kind: input, shape index: {}]   ;;  %s1363_s2 = inlined_call_operand.vmem [shape: f32[1,128], index: 2, kind: input, shape index: {}]   ;;  %s1364_s3 = inlined_call_operand.hbm [shape: bf16[128,128], index: 3, kind: input, shape index: {}]   ;;  %s1365_s4 = inlined_call_operand.vmem [shape: f32[1,128], index: 4, kind: input, shape index: {}]   ;;  %s1366_s5 = inlined_call_operand.hbm [shape: bf16[32,128], index: 5, kind: output, shape index: {}]  }
   0x1   :  { %12 = vsyncpa [#allocation4 + $0x1], 0 }
   0x2   :  { %13 = vsyncpa [#allocation7], 0 }
   0x3   :  { %14 = vsyncpa [#allocation5], 0 }
   0x4   :  { %16 = vsyncpa [#allocation5 + $0x1], 0  ;;  %s1095_s18 = smov 0   ;;  %s1097_s19 = smov 0  }
   0x5   :  { %s1099_s20 = smov 0   ;;  %s1101_s21 = smov 0  }
   0x6   :  { %s1103_s22 = smov 0   ;;  %s1105_s23 = smov 0  }
   0x7 LB: > { %s664_s24 = sadd.s32 4294967295, %s1051_s23   ;;  %s665_s25 = sadd.s32 4294967294, %s1051_s23   ;;  %s1051_s23 = sphi %s1105_s23, %s22_s23   ;;  %s1047_s22 = sphi %s1103_s22, %s1388_s22   ;;  %s1043_s21 = sphi %s1101_s21, %s1387_s21   ;;  %s1039_s20 = sphi %s1099_s20, %s1386_s20   ;;  %s1035_s19 = sphi %s1097_s19, %s1385_s19   ;;  %s1031_s18 = sphi %s1095_s18, %s1384_s18  }
   0x8   : > { %p56_p0 = scmp.ne.s32.totalorder %s1035_s19, %s1031_s18  ;;  %p1129_p1 = scmp.eq.s32.totalorder %s664_s24, 0 }
   0x9   : > { %p1133_p2 = scmp.eq.s32.totalorder %s664_s24, 1  ;;  %p170_p3 = scmp.eq.s32.totalorder %s665_s25, 1 }
   0xa   : > { %s1371_s26 = scalar_select %p1129_p1, 1, 0 }
   0xb   : > { %p1139_p4 = por %p1129_p1, %p56_p0  ;;  %p666_p5 = scmp.ge.s32.totalorder %s1051_s23, 1 }
   0xc   : > { %p1144_p6 = por %p170_p3, %p56_p0  ;;  %p177_p7 = scmp.lt.s32.totalorder %s1051_s23, 3 }
   0xd   : > { %s1373_s28 = scalar_select %p1139_p4, 1, 0 }
   0xe   : > { %s1374_s29 = scalar_select %p1144_p6, 1, 0 }
   0xf   : > { %p1149_p8 = pnand %p666_p5, %p177_p7  ;;  %s1053_s6 = smov [#allocation6]  }
  0x10   : > { %s189_s7 = sshll.u32 %s1053_s6, 4  ;;  %s1054_s9 = smov [#allocation8]   ;;  %s1153_s7 = int_to_ptr.vmem [resolvable:$true] %s189_s7 }
  0x11   : > { %p782_p9 = pneg %p1149_p8  ;;  %s205_s10 = sshll.u32 %s1054_s9, 4  ;;  %s1164_s10 = int_to_ptr.vmem [resolvable:$true] %s205_s10 }
  0x12   : > { %s879_s13 = scalar_lea.hbm %s1362_s1, 1024 }
  0x13   : > { %p1160_p11 = pnand %p782_p9, %p1129_p1  ;;  %p880_p12 = scmp.ne.s32.totalorder %s1362_s1, %s879_s13 }
  0x14   : > { %p886_p5 = scmp.lt.u32.totalorder %s879_s13, %s1362_s1 }
  0x15   : > { %p881_p13 = pneg %p1160_p11 }
  0x17   : > { %p882_p0 = pnand %p881_p13, %p880_p12 }
  0x19   : > { %p883_p3 = pneg %p882_p0 }
  0x1b   : > { %p888_p7 = pnand %p886_p5, %p883_p3 }
  0x1d   : > { %891 = shalt.err (!%p888_p7)
}
  0x1e   : > { %s892_s24 = scalar_lea.vmem %s1153_s7, 1024  ;;  %p900_p1 = scmp.lt.s32.totalorder %s1153_s7, %s1153_s7 }
  0x1f   : > { %p893_p9 = scmp.ne.s32.totalorder %s1153_s7, %s892_s24  ;;  %p901_p12 = scmp.lt.s32.totalorder %s892_s24, %s892_s24 }
  0x21   : > { %p895_p10 = pnand %p893_p9, %p881_p13  ;;  %p902_p0 = por %p901_p12, %p900_p1 }
  0x23   : > { %p896_p6 = pneg %p895_p10 }
  0x25   : > { %p903_p4 = pnand %p902_p0, %p896_p6 }
  0x27   : > { %906 = shalt.err (!%p903_p4)
}
  0x28   : > { %s1055_s25 = smov 64   ;;  %s1056_s6 = smov 4  }
  0x29   : > { %785 = dma.hbm_to_vmem [thread:$0]  (!%p1160_p11), %s1362_s1, 1024, %s1153_s7, [#allocation7], %s1055_s25, %s1055_s25, %s1056_s6  }
  0x2a   : > { %s907_s14 = scalar_lea.hbm %s1364_s3, 1024 }
  0x2b   : > { %p908_p1 = scmp.ne.s32.totalorder %s1364_s3, %s907_s14  ;;  %p914_p10 = scmp.lt.u32.totalorder %s907_s14, %s1364_s3 }
  0x2d   : > { %p910_p4 = pnand %p908_p1, %p881_p13 }
  0x2f   : > { %p911_p6 = pneg %p910_p4 }
  0x31   : > { %p916_p3 = pnand %p914_p10, %p911_p6 }
  0x33   : > { %919 = shalt.err (!%p916_p3)
}
  0x34   : > { %s920_s7 = scalar_lea.vmem %s1164_s10, 1024  ;;  %p928_p12 = scmp.lt.s32.totalorder %s1164_s10, %s1164_s10 }
  0x35   : > { %p921_p5 = scmp.ne.s32.totalorder %s1164_s10, %s920_s7  ;;  %p929_p0 = scmp.lt.s32.totalorder %s920_s7, %s920_s7 }
  0x37   : > { %p923_p7 = pnand %p921_p5, %p881_p13  ;;  %p930_p1 = por %p929_p0, %p928_p12 }
  0x39   : > { %p924_p9 = pneg %p923_p7 }
  0x3b   : > { %p931_p4 = pnand %p930_p1, %p924_p9 }
  0x3d   : > { %934 = shalt.err (!%p931_p4)
}
  0x3e   : > { %788 = dma.hbm_to_vmem [thread:$0]  (!%p1160_p11), %s1364_s3, 1024, %s1164_s10, [#allocation7], %s1055_s25, %s1055_s25, %s1056_s6  }
  0x3f   : > { %s34_s12 = sadd.s32 1, %s1047_s22  ;;  %s43_s13 = sadd.s32 1, %s1039_s20 }
  0x40   : > { %p36_p13 = scmp.ge.s32.totalorder %s34_s12, 2  ;;  %p50_p6 = scmp.ne.s32.totalorder %s1039_s20, %s1035_s19 }
  0x41   : > { %p51_p10 = scmp.eq.s32.totalorder %s1051_s23, 0  ;;  %p799_p3 = scmp.lt.s32.totalorder %s1051_s23, 2 }
  0x42   : > { %s1390_s12 = smov (%p36_p13, %s34_s12), 0  ;;  %p1228_p7 = por %p1133_p2, %p50_p6 }
  0x43   : > { %p52_p5 = por %p51_p10, %p50_p6  ;;  %s38_s14 = ssub.s32 %s1047_s22, %s1390_s12 }
  0x44   : > { %s1377_s8 = scalar_select %p1228_p7, 1, 0 }
  0x45   : > { %s222_s15 = sand.u32 1, %s1039_s20   ;;  %p41_p9 = scmp.eq.s32.totalorder %s38_s14, 0 }
  0x46   : > { %s670_s10 = sshll.u32 %s222_s15, 4  ;;  %s703_s25 = sshll.u32 %s1047_s22, 8 }
  0x47   : > { %s1237_s6 = scalar_select %p41_p9, %s1039_s20, %s43_s13  }
  0x48   : > { %s1242_s24 = scalar_lea.hbm %s1361_s0, %s703_s25  ;;  %s226_s27 = scalar_lea.vmem [#allocation3], %s670_s10 }
  0x49   : > { %s234_s7 = sshll.u32 %s226_s27, 4  ;;  %p1246_p2 = pnand %p799_p3, %p52_p5  ;;  %s1250_s7 = int_to_ptr.vmem [resolvable:$true] %s234_s7 }
  0x4a   : > { %s1252_s11 = scalar_lea.sflag [#allocation4], %s222_s15  ;;  %s935_s13 = scalar_lea.hbm %s1242_s24, 256 }
  0x4b   : > { %p936_p11 = scmp.ne.s32.totalorder %s1242_s24, %s935_s13  ;;  %p937_p12 = pneg %p1246_p2 }
  0x4c   : > { %s940_s25 = scalar_lea.hbm %s1361_s0, 512  ;;  %p941_p4 = scmp.lt.u32.totalorder %s1242_s24, %s1361_s0 }
  0x4d   : > { %p938_p0 = pnand %p937_p12, %p936_p11  ;;  %p942_p13 = scmp.lt.u32.totalorder %s940_s25, %s935_s13 }
  0x4e   : > { %p944_p10 = scmp.lt.u32.totalorder %s935_s13, %s1242_s24 }
  0x4f   : > { %p939_p1 = pneg %p938_p0  ;;  %p943_p6 = por %p942_p13, %p941_p4 }
  0x51   : > { %p945_p3 = por %p944_p10, %p943_p6 }
  0x53   : > { %p946_p5 = pnand %p945_p3, %p939_p1 }
  0x55   : > { %949 = shalt.err (!%p946_p5)
}
  0x56   : > { %s950_s15 = scalar_lea.vmem %s1250_s7, 256  ;;  %s1057_s27 = smov [#allocation3]  }
  0x57   : > { %p951_p9 = scmp.ne.s32.totalorder %s1250_s7, %s950_s15  ;;  %s955_s14 = sshll.u32 %s1057_s27, 4  ;;  %s956_s14 = int_to_ptr.vmem [resolvable:$false] %s955_s14 }
  0x58   : > { %s957_s10 = scalar_lea.vmem %s956_s14, 512  ;;  %p958_p7 = scmp.lt.s32.totalorder %s1250_s7, %s956_s14 }
  0x59   : > { %p953_p11 = pnand %p951_p9, %p937_p12  ;;  %p959_p4 = scmp.lt.s32.totalorder %s957_s10, %s950_s15 }
  0x5b   : > { %p954_p0 = pneg %p953_p11  ;;  %p960_p13 = por %p959_p4, %p958_p7 }
  0x5d   : > { %p961_p6 = pnand %p960_p13, %p954_p0 }
  0x5f   : > { %964 = shalt.err (!%p961_p6)
}
  0x60   : > { %s1058_s13 = smov 128   ;;  %s1059_s25 = smov 8  }
  0x61   : > { %792 = dma.hbm_to_vmem [thread:$0]  (!%p1246_p2), %s1242_s24, 256, %s1250_s7, %s1252_s11, %s1058_s13, %s1058_s13, %s1059_s25  }
  0x62   : > { %246 = sbr.rel (%p1149_p8) target bundleno = 606 (0x25e), region = 40  ;;  %s1283_s16 = sand.u32 (!%p1149_p8), 1, %s1035_s19  }
  0x63   : > { %s674_s17 = sshll.u32 (!%p1149_p8), %s1283_s16, 4  ;;  %s249_s15 = scalar_lea.sflag (!%p1149_p8), [#allocation4], %s1283_s16 }
  0x64   : > { %s1287_s27 = scalar_lea.vmem (!%p1149_p8), [#allocation3], %s674_s17  ;;  %p1379_p7 = scmp.ne.s32.totalorder (!%p1149_p8), %s1373_s28, 0 }
  0x69   : > { %1018 = dma.done.wait (%p1379_p7), %s249_s15, 256  }
  0x6a   : > { %1020 = vsyncadd (%p1379_p7), %s249_s15, 4294967040  ;;  %p1380_p2 = scmp.ne.s32.totalorder %s1371_s26, 0 }
  0x6c   : > { %1022 = dma.done.wait (%p1380_p2), [#allocation7], 2048  }
  0x6d   : > { %1024 = vsyncadd (%p1380_p2), [#allocation7], 4294965248  ;;  %v1060_v0 = vmov 0.0   ;;  %vm1061_vm0 = vmmov 0   ;;  %v861_v1 = vld [vmem:[#allocation6] sm:$0xff]   ;;  %v862_v2 = vld [vmem:[#allocation6 + $0x8] sm:$0xff]  }
  0x6e   : > { %730 = vmatprep.subr.bf16.mxu0 %v1060_v0  ;;  %746 = vmatprep.mubr.msk.bf16.mxu0 %vm1061_vm0, %v1060_v0  ;;  %v863_v3 = vld [vmem:[#allocation6 + $0x10] sm:$0xff]   ;;  %v869_v4 = vld [vmem:[#allocation8] sm:$0xff]   ;;  %v864_v5 = vld [vmem:[#allocation6 + $0x18] sm:$0xff]   ;;  %s677_s30 = sshll.u32 %s1283_s16, 3  ;;  %s706_s14 = sshll.u32 %s1043_s21, 7 }
  0x6f   : > { %750 = vmatprep.subr.bf16.mxu1 %v1060_v0  ;;  %766 = vmatprep.mubr.msk.bf16.mxu1 %vm1061_vm0, %v1060_v0  ;;  %v870_v6 = vld [vmem:[#allocation8 + $0x8] sm:$0xff]   ;;  %v865_v7 = vld [vmem:[#allocation6 + $0x20] sm:$0xff]   ;;  %v871_v8 = vld [vmem:[#allocation8 + $0x10] sm:$0xff]   ;;  %s286_s9 = scalar_lea.vmem [#allocation9], %s677_s30  ;;  %s1312_s25 = scalar_lea.hbm %s1366_s5, %s706_s14 }
  0x70   : > { %731 = vmatpush3.bf16.msra.mxu0 %v861_v1  ;;  %751 = vmatpush3.bf16.msra.mxu1 %v869_v4  ;;  %v866_v9 = vld [vmem:[#allocation6 + $0x28] sm:$0xff]   ;;  %v867_v10 = vld [vmem:[#allocation6 + $0x30] sm:$0xff]   ;;  %v868_v11 = vld [vmem:[#allocation6 + $0x38] sm:$0xff]   ;;  %s562_s11 = sshll.u32 %s286_s9, 4  ;;  %s549_s17 = scalar_lea.sflag [#allocation5], %s1283_s16  ;;  %s1307_s11 = int_to_ptr.vmem [resolvable:$true] %s562_s11 }
  0x71   : > { %732 = vmatprep.subr.bf16.mxu0 %v1060_v0  ;;  %752 = vmatprep.subr.bf16.mxu1 %v1060_v0  ;;  %v298_v12 = vld [vmem:[%s1287_s27] sm:$0xff]  ;;  %v299_v13 = vld [vmem:[%s1287_s27 + $0x8] sm:$0xff]  ;;  %s965_s15 = scalar_lea.vmem %s1307_s11, 128  ;;  %p1381_p12 = scmp.ne.s32.totalorder %s1377_s8, 0 }
  0x72   : > { %v300_v14 = vpack.c.bf16 %v299_v13, %v298_v12  ;;  %v872_v15 = vld [vmem:[#allocation8 + $0x18] sm:$0xff]   ;;  %v873_v16 = vld [vmem:[#allocation8 + $0x20] sm:$0xff]   ;;  %v874_v17 = vld [vmem:[#allocation8 + $0x28] sm:$0xff]   ;;  %p966_p8 = scmp.ne.s32.totalorder %s1307_s11, %s965_s15  ;;  %s1062_s21 = smov [#allocation9]  }
  0x73   : > { %v875_v18 = vld [vmem:[#allocation8 + $0x30] sm:$0xff]   ;;  %v876_v19 = vld [vmem:[#allocation8 + $0x38] sm:$0xff]   ;;  %v686_v21 = vld [vmem:[%s1363_s2] ss:$0 sm:$0xff]  ;;  %s969_s27 = sshll.u32 %s1062_s21, 4  ;;  %s970_s27 = int_to_ptr.vmem [resolvable:$false] %s969_s27 }
  0x74   : > { %733 = vmatpush3.bf16.msra.mxu0 %v862_v2  ;;  %753 = vmatpush3.bf16.msra.mxu1 %v870_v6  ;;  %v687_v29 = vld [vmem:[%s1365_s4] ss:$0 sm:$0xff]  ;;  %p967_p1 = pnand %p966_p8, %p1381_p12  ;;  %s971_s26 = scalar_lea.vmem %s970_s27, 256 }
  0x75   : > { %734 = vmatprep.subr.bf16.mxu0 %v1060_v0  ;;  %754 = vmatprep.subr.bf16.mxu1 %v1060_v0  ;;  %p972_p3 = scmp.lt.s32.totalorder %s1307_s11, %s970_s27  ;;  %p973_p5 = scmp.lt.s32.totalorder %s971_s26, %s965_s15 }
  0x76   : > { %p968_p10 = pneg %p967_p1 }
  0x77   : > { %p974_p9 = por %p973_p5, %p972_p3 }
  0x78   : > { %735 = vmatpush3.bf16.msra.mxu0 %v863_v3  ;;  %755 = vmatpush3.bf16.msra.mxu1 %v871_v8 }
  0x79   : > { %736 = vmatprep.subr.bf16.mxu0 %v1060_v0  ;;  %756 = vmatprep.subr.bf16.mxu1 %v1060_v0  ;;  %p975_p11 = pnand %p974_p9, %p968_p10 }
  0x7c   : > { %737 = vmatpush3.bf16.msra.mxu0 %v864_v5  ;;  %757 = vmatpush3.bf16.msra.mxu1 %v872_v15 }
  0x7d   : > { %738 = vmatprep.subr.bf16.mxu0 %v1060_v0  ;;  %758 = vmatprep.subr.bf16.mxu1 %v1060_v0 }
  0x80   : > { %739 = vmatpush3.bf16.msra.mxu0 %v865_v7  ;;  %759 = vmatpush3.bf16.msra.mxu1 %v873_v16 }
  0x81   : > { %740 = vmatprep.subr.bf16.mxu0 %v1060_v0  ;;  %760 = vmatprep.subr.bf16.mxu1 %v1060_v0 }
  0x84   : > { %741 = vmatpush3.bf16.msra.mxu0 %v866_v9  ;;  %761 = vmatpush3.bf16.msra.mxu1 %v874_v17 }
  0x85   : > { %742 = vmatprep.subr.bf16.mxu0 %v1060_v0  ;;  %762 = vmatprep.subr.bf16.mxu1 %v1060_v0 }
  0x88   : > { %743 = vmatpush3.bf16.msra.mxu0 %v867_v10  ;;  %763 = vmatpush3.bf16.msra.mxu1 %v875_v18 }
  0x89   : > { %744 = vmatprep.subr.bf16.mxu0 %v1060_v0  ;;  %764 = vmatprep.subr.bf16.mxu1 %v1060_v0 }
  0x8c   : > { %745 = vmatpush3.bf16.msra.mxu0 %v868_v11  ;;  %765 = vmatpush3.bf16.msra.mxu1 %v876_v19 }
  0x8f   : > { %747 = vmatmul.mubr.bf16.vlgmr.msra.gmra.mrb[0].mxu0 %v300_v14 }
 0x162   : > { %v399_v20 = vpop.f32.mrb[0].mxu0 }
 0x163   : > { %v748_v22 = vpop.f32.mrb[1].mxu0  ;;  %v422_v24 = vadd.f32 %v686_v21, %v399_v20 }
 0x164   : > { %v402_v23 = vpop.f32.mrb[2].mxu0 }
 0x165   : > { %v423_v25 = vadd.f32 %v686_v21, %v402_v23  ;;  %v749_v26 = vpop.f32.mrb[3].mxu0 }
 0x167   : > { %v424_v27 = vpack.c.bf16 %v423_v25, %v422_v24 }
 0x169   : > { %877 = vtanh.bf16 %v424_v27 }
 0x174   : > { %v878_v28 = vpop.eup %877 }
 0x175   : > { %767 = vmatmul.mubr.bf16.vlgmr.msra.gmra.mrb[0].mxu1 %v878_v28 }
 0x248   : > { %v531_v30 = vpop.f32.mrb[0].mxu1 }
 0x249   : > { %v768_v31 = vpop.f32.mrb[1].mxu1  ;;  %v532_v33 = vadd.f32 %v687_v29, %v531_v30 }
 0x24a   : > { %v534_v32 = vpop.f32.mrb[2].mxu1 }
 0x24b   : > { %v535_v34 = vadd.f32 %v687_v29, %v534_v32  ;;  %v769_v35 = vpop.f32.mrb[3].mxu1 }
 0x24d   : > { %v710_v36 = vpack.c.bf16 %v535_v34, %v532_v33 }
 0x24f   : > { %711 = vst [vmem:[%s286_s9] sm:$0xff] %v710_v36  }
 0x250   : > { %978 = shalt.err (!%p975_p11)
}
 0x251   : > { %s979_s28 = scalar_lea.hbm %s1312_s25, 128  ;;  %s983_s7 = scalar_lea.hbm %s1366_s5, 256 }
 0x252   : > { %p980_p0 = scmp.ne.s32.totalorder %s1312_s25, %s979_s28  ;;  %p984_p6 = scmp.lt.u32.totalorder %s1312_s25, %s1366_s5 }
 0x253   : > { %p985_p7 = scmp.lt.u32.totalorder %s983_s7, %s979_s28  ;;  %p987_p8 = scmp.lt.u32.totalorder %s979_s28, %s1312_s25 }
 0x254   : > { %p981_p4 = pnand %p980_p0, %p1381_p12 }
 0x255   : > { %p986_p2 = por %p985_p7, %p984_p6 }
 0x256   : > { %p982_p13 = pneg %p981_p4 }
 0x257   : > { %p988_p1 = por %p987_p8, %p986_p2 }
 0x259   : > { %p989_p10 = pnand %p988_p1, %p982_p13 }
 0x25b   : > { %992 = shalt.err (!%p989_p10)
}
 0x25c   : > { %s1063_s10 = smov 64   ;;  %s1064_s13 = smov 4  }
 0x25d   : > { %780 = dma.vmem_to_hbm [thread:$0]  (%p1381_p12), %s1307_s11, 128, %s1312_s25, %s549_s17, %s1063_s10, %s1063_s10, %s1064_s13  }
 0x25e PF: > { %s577_s15 = sand.u32 1, %s1031_s18   ;;  %p1382_p3 = scmp.ne.s32.totalorder %s1374_s29, 0 }
 0x25f   : > { %p1383_p5 = scmp.ge.s32.totalorder %s1051_s23, 2  ;;  %s578_s21 = scalar_lea.sflag [#allocation5], %s577_s15 }
 0x261   : > { %p794_p9 = pnand %p1383_p5, %p1382_p3 }
 0x263   : > { %1026 = dma.done.wait (!%p794_p9), %s578_s21, 128  }
 0x264   : > { %1028 = vsyncadd (!%p794_p9), %s578_s21, 4294967168  ;;  %s22_s23 = sadd.s32 1, %s1051_s23   ;;  %s1384_s18 = smov %s1035_s19 }
 0x265   : > { %p19_p11 = scmp.ge.s32.totalorder %s22_s23, 4   ;;  %s1385_s19 = smov %s1039_s20 }
 0x266   : > { %s1386_s20 = smov %s1237_s6  ;;  %s1387_s21 = smov %s1047_s22 }
 0x267   : > { %s1388_s22 = smov %s1390_s12  ;;  %21 = sbr.rel (!%p19_p11) target bundleno = 7 (0x7), region = 101 }
 0x26e   :  { %583 = vsyncpa [#allocation4], 1 }
 0x26f   :  { %585 = vsyncpa [#allocation4 + $0x1], 1 }
 0x270   :  { %586 = vsyncpa [#allocation7], 1 }
 0x271   :  { %587 = vsyncpa [#allocation5], 1 }
 0x272   :  { %589 = vsyncpa [#allocation5 + $0x1], 1 }

// kernel: tpu_custom_call.1
= control target key start
LH: loop header
LB: loop body
LE: loop exit
PB: predicated region body
PF: predicated region fallthrough
CT: control target
= control target key end

     0   :  { %10 = vsyncpa [#allocation4], 0  ;;  %s1361_s0 = inlined_call_operand.hbm [shape: f32[32,128], index: 0, kind: input, shape index: {}]   ;;  %s1362_s1 = inlined_call_operand.hbm [shape: bf16[128,128], index: 1, kind: input, shape index: {}]   ;;  %s1363_s2 = inlined_call_operand.vmem [shape: f32[1,128], index: 2, kind: input, shape index: {}]   ;;  %s1364_s3 = inlined_call_operand.hbm [shape: bf16[128,128], index: 3, kind: input, shape index: {}]   ;;  %s1365_s4 = inlined_call_operand.vmem [shape: f32[1,128], index: 4, kind: input, shape index: {}]   ;;  %s1366_s5 = inlined_call_operand.hbm [shape: bf16[32,128], index: 5, kind: output, shape index: {}]  }
   0x1   :  { %12 = vsyncpa [#allocation4 + $0x1], 0 }
   0x2   :  { %13 = vsyncpa [#allocation7], 0 }
   0x3   :  { %14 = vsyncpa [#allocation5], 0 }
   0x4   :  { %16 = vsyncpa [#allocation5 + $0x1], 0  ;;  %s1095_s18 = smov 0   ;;  %s1097_s19 = smov 0  }
   0x5   :  { %s1099_s20 = smov 0   ;;  %s1101_s21 = smov 0  }
   0x6   :  { %s1103_s22 = smov 0   ;;  %s1105_s23 = smov 0  }
   0x7 LB: > { %s664_s24 = sadd.s32 4294967295, %s1051_s23   ;;  %s665_s25 = sadd.s32 4294967294, %s1051_s23   ;;  %s1051_s23 = sphi %s1105_s23, %s22_s23   ;;  %s1047_s22 = sphi %s1103_s22, %s1388_s22   ;;  %s1043_s21 = sphi %s1101_s21, %s1387_s21   ;;  %s1039_s20 = sphi %s1099_s20, %s1386_s20   ;;  %s1035_s19 = sphi %s1097_s19, %s1385_s19   ;;  %s1031_s18 = sphi %s1095_s18, %s1384_s18  }
   0x8   : > { %p56_p0 = scmp.ne.s32.totalorder %s1035_s19, %s1031_s18  ;;  %p1129_p1 = scmp.eq.s32.totalorder %s664_s24, 0 }
   0x9   : > { %p1133_p2 = scmp.eq.s32.totalorder %s664_s24, 1  ;;  %p170_p3 = scmp.eq.s32.totalorder %s665_s25, 1 }
   0xa   : > { %s1371_s26 = scalar_select %p1129_p1, 1, 0 }
   0xb   : > { %p1139_p4 = por %p1129_p1, %p56_p0  ;;  %p666_p5 = scmp.ge.s32.totalorder %s1051_s23, 1 }
   0xc   : > { %p1144_p6 = por %p170_p3, %p56_p0  ;;  %p177_p7 = scmp.lt.s32.totalorder %s1051_s23, 3 }
   0xd   : > { %s1373_s28 = scalar_select %p1139_p4, 1, 0 }
   0xe   : > { %s1374_s29 = scalar_select %p1144_p6, 1, 0 }
   0xf   : > { %p1149_p8 = pnand %p666_p5, %p177_p7  ;;  %s1053_s6 = smov [#allocation6]  }
  0x10   : > { %s189_s7 = sshll.u32 %s1053_s6, 4  ;;  %s1054_s9 = smov [#allocation8]   ;;  %s1153_s7 = int_to_ptr.vmem [resolvable:$true] %s189_s7 }
  0x11   : > { %p782_p9 = pneg %p1149_p8  ;;  %s205_s10 = sshll.u32 %s1054_s9, 4  ;;  %s1164_s10 = int_to_ptr.vmem [resolvable:$true] %s205_s10 }
  0x12   : > { %s879_s13 = scalar_lea.hbm %s1362_s1, 1024 }
  0x13   : > { %p1160_p11 = pnand %p782_p9, %p1129_p1  ;;  %p880_p12 = scmp.ne.s32.totalorder %s1362_s1, %s879_s13 }
  0x14   : > { %p886_p5 = scmp.lt.u32.totalorder %s879_s13, %s1362_s1 }
  0x15   : > { %p881_p13 = pneg %p1160_p11 }
  0x17   : > { %p882_p0 = pnand %p881_p13, %p880_p12 }
  0x19   : > { %p883_p3 = pneg %p882_p0 }
  0x1b   : > { %p888_p7 = pnand %p886_p5, %p883_p3 }
  0x1d   : > { %891 = shalt.err (!%p888_p7)
}
  0x1e   : > { %s892_s24 = scalar_lea.vmem %s1153_s7, 1024  ;;  %p900_p1 = scmp.lt.s32.totalorder %s1153_s7, %s1153_s7 }
  0x1f   : > { %p893_p9 = scmp.ne.s32.totalorder %s1153_s7, %s892_s24  ;;  %p901_p12 = scmp.lt.s32.totalorder %s892_s24, %s892_s24 }
  0x21   : > { %p895_p10 = pnand %p893_p9, %p881_p13  ;;  %p902_p0 = por %p901_p12, %p900_p1 }
  0x23   : > { %p896_p6 = pneg %p895_p10 }
  0x25   : > { %p903_p4 = pnand %p902_p0, %p896_p6 }
  0x27   : > { %906 = shalt.err (!%p903_p4)
}
  0x28   : > { %s1055_s25 = smov 64   ;;  %s1056_s6 = smov 4  }
  0x29   : > { %785 = dma.hbm_to_vmem [thread:$0]  (!%p1160_p11), %s1362_s1, 1024, %s1153_s7, [#allocation7], %s1055_s25, %s1055_s25, %s1056_s6  }
  0x2a   : > { %s907_s14 = scalar_lea.hbm %s1364_s3, 1024 }
  0x2b   : > { %p908_p1 = scmp.ne.s32.totalorder %s1364_s3, %s907_s14  ;;  %p914_p10 = scmp.lt.u32.totalorder %s907_s14, %s1364_s3 }
  0x2d   : > { %p910_p4 = pnand %p908_p1, %p881_p13 }
  0x2f   : > { %p911_p6 = pneg %p910_p4 }
  0x31   : > { %p916_p3 = pnand %p914_p10, %p911_p6 }
  0x33   : > { %919 = shalt.err (!%p916_p3)
}
  0x34   : > { %s920_s7 = scalar_lea.vmem %s1164_s10, 1024  ;;  %p928_p12 = scmp.lt.s32.totalorder %s1164_s10, %s1164_s10 }
  0x35   : > { %p921_p5 = scmp.ne.s32.totalorder %s1164_s10, %s920_s7  ;;  %p929_p0 = scmp.lt.s32.totalorder %s920_s7, %s920_s7 }
  0x37   : > { %p923_p7 = pnand %p921_p5, %p881_p13  ;;  %p930_p1 = por %p929_p0, %p928_p12 }
  0x39   : > { %p924_p9 = pneg %p923_p7 }
  0x3b   : > { %p931_p4 = pnand %p930_p1, %p924_p9 }
  0x3d   : > { %934 = shalt.err (!%p931_p4)
}
  0x3e   : > { %788 = dma.hbm_to_vmem [thread:$0]  (!%p1160_p11), %s1364_s3, 1024, %s1164_s10, [#allocation7], %s1055_s25, %s1055_s25, %s1056_s6  }
  0x3f   : > { %s34_s12 = sadd.s32 1, %s1047_s22  ;;  %s43_s13 = sadd.s32 1, %s1039_s20 }
  0x40   : > { %p36_p13 = scmp.ge.s32.totalorder %s34_s12, 2  ;;  %p50_p6 = scmp.ne.s32.totalorder %s1039_s20, %s1035_s19 }
  0x41   : > { %p51_p10 = scmp.eq.s32.totalorder %s1051_s23, 0  ;;  %p799_p3 = scmp.lt.s32.totalorder %s1051_s23, 2 }
  0x42   : > { %s1390_s12 = smov (%p36_p13, %s34_s12), 0  ;;  %p1228_p7 = por %p1133_p2, %p50_p6 }
  0x43   : > { %p52_p5 = por %p51_p10, %p50_p6  ;;  %s38_s14 = ssub.s32 %s1047_s22, %s1390_s12 }
  0x44   : > { %s1377_s8 = scalar_select %p1228_p7, 1, 0 }
  0x45   : > { %s222_s15 = sand.u32 1, %s1039_s20   ;;  %p41_p9 = scmp.eq.s32.totalorder %s38_s14, 0 }
  0x46   : > { %s670_s10 = sshll.u32 %s222_s15, 4  ;;  %s703_s25 = sshll.u32 %s1047_s22, 8 }
  0x47   : > { %s1237_s6 = scalar_select %p41_p9, %s1039_s20, %s43_s13  }
  0x48   : > { %s1242_s24 = scalar_lea.hbm %s1361_s0, %s703_s25  ;;  %s226_s27 = scalar_lea.vmem [#allocation3], %s670_s10 }
  0x49   : > { %s234_s7 = sshll.u32 %s226_s27, 4  ;;  %p1246_p2 = pnand %p799_p3, %p52_p5  ;;  %s1250_s7 = int_to_ptr.vmem [resolvable:$true] %s234_s7 }
  0x4a   : > { %s1252_s11 = scalar_lea.sflag [#allocation4], %s222_s15  ;;  %s935_s13 = scalar_lea.hbm %s1242_s24, 256 }
  0x4b   : > { %p936_p11 = scmp.ne.s32.totalorder %s1242_s24, %s935_s13  ;;  %p937_p12 = pneg %p1246_p2 }
  0x4c   : > { %s940_s25 = scalar_lea.hbm %s1361_s0, 512  ;;  %p941_p4 = scmp.lt.u32.totalorder %s1242_s24, %s1361_s0 }
  0x4d   : > { %p938_p0 = pnand %p937_p12, %p936_p11  ;;  %p942_p13 = scmp.lt.u32.totalorder %s940_s25, %s935_s13 }
  0x4e   : > { %p944_p10 = scmp.lt.u32.totalorder %s935_s13, %s1242_s24 }
  0x4f   : > { %p939_p1 = pneg %p938_p0  ;;  %p943_p6 = por %p942_p13, %p941_p4 }
  0x51   : > { %p945_p3 = por %p944_p10, %p943_p6 }
  0x53   : > { %p946_p5 = pnand %p945_p3, %p939_p1 }
  0x55   : > { %949 = shalt.err (!%p946_p5)
}
  0x56   : > { %s950_s15 = scalar_lea.vmem %s1250_s7, 256  ;;  %s1057_s27 = smov [#allocation3]  }
  0x57   : > { %p951_p9 = scmp.ne.s32.totalorder %s1250_s7, %s950_s15  ;;  %s955_s14 = sshll.u32 %s1057_s27, 4  ;;  %s956_s14 = int_to_ptr.vmem [resolvable:$false] %s955_s14 }
  0x58   : > { %s957_s10 = scalar_lea.vmem %s956_s14, 512  ;;  %p958_p7 = scmp.lt.s32.totalorder %s1250_s7, %s956_s14 }
  0x59   : > { %p953_p11 = pnand %p951_p9, %p937_p12  ;;  %p959_p4 = scmp.lt.s32.totalorder %s957_s10, %s950_s15 }
  0x5b   : > { %p954_p0 = pneg %p953_p11  ;;  %p960_p13 = por %p959_p4, %p958_p7 }
  0x5d   : > { %p961_p6 = pnand %p960_p13, %p954_p0 }
  0x5f   : > { %964 = shalt.err (!%p961_p6)
}
  0x60   : > { %s1058_s13 = smov 128   ;;  %s1059_s25 = smov 8  }
  0x61   : > { %792 = dma.hbm_to_vmem [thread:$0]  (!%p1246_p2), %s1242_s24, 256, %s1250_s7, %s1252_s11, %s1058_s13, %s1058_s13, %s1059_s25  }
  0x62   : > { %246 = sbr.rel (%p1149_p8) target bundleno = 606 (0x25e), region = 40  ;;  %s1283_s16 = sand.u32 (!%p1149_p8), 1, %s1035_s19  }
  0x63   : > { %s674_s17 = sshll.u32 (!%p1149_p8), %s1283_s16, 4  ;;  %s249_s15 = scalar_lea.sflag (!%p1149_p8), [#allocation4], %s1283_s16 }
  0x64   : > { %s1287_s27 = scalar_lea.vmem (!%p1149_p8), [#allocation3], %s674_s17  ;;  %p1379_p7 = scmp.ne.s32.totalorder (!%p1149_p8), %s1373_s28, 0 }
  0x69   : > { %1018 = dma.done.wait (%p1379_p7), %s249_s15, 256  }
  0x6a   : > { %1020 = vsyncadd (%p1379_p7), %s249_s15, 4294967040  ;;  %p1380_p2 = scmp.ne.s32.totalorder %s1371_s26, 0 }
  0x6c   : > { %1022 = dma.done.wait (%p1380_p2), [#allocation7], 2048  }
  0x6d   : > { %1024 = vsyncadd (%p1380_p2), [#allocation7], 4294965248  ;;  %v1060_v0 = vmov 0.0   ;;  %vm1061_vm0 = vmmov 0   ;;  %v861_v1 = vld [vmem:[#allocation6] sm:$0xff]   ;;  %v862_v2 = vld [vmem:[#allocation6 + $0x8] sm:$0xff]  }
  0x6e   : > { %730 = vmatprep.subr.bf16.mxu0 %v1060_v0  ;;  %746 = vmatprep.mubr.msk.bf16.mxu0 %vm1061_vm0, %v1060_v0  ;;  %v863_v3 = vld [vmem:[#allocation6 + $0x10] sm:$0xff]   ;;  %v869_v4 = vld [vmem:[#allocation8] sm:$0xff]   ;;  %v864_v5 = vld [vmem:[#allocation6 + $0x18] sm:$0xff]   ;;  %s677_s30 = sshll.u32 %s1283_s16, 3  ;;  %s706_s14 = sshll.u32 %s1043_s21, 7 }
  0x6f   : > { %750 = vmatprep.subr.bf16.mxu1 %v1060_v0  ;;  %766 = vmatprep.mubr.msk.bf16.mxu1 %vm1061_vm0, %v1060_v0  ;;  %v870_v6 = vld [vmem:[#allocation8 + $0x8] sm:$0xff]   ;;  %v865_v7 = vld [vmem:[#allocation6 + $0x20] sm:$0xff]   ;;  %v871_v8 = vld [vmem:[#allocation8 + $0x10] sm:$0xff]   ;;  %s286_s9 = scalar_lea.vmem [#allocation9], %s677_s30  ;;  %s1312_s25 = scalar_lea.hbm %s1366_s5, %s706_s14 }
  0x70   : > { %731 = vmatpush3.bf16.msra.mxu0 %v861_v1  ;;  %751 = vmatpush3.bf16.msra.mxu1 %v869_v4  ;;  %v866_v9 = vld [vmem:[#allocation6 + $0x28] sm:$0xff]   ;;  %v867_v10 = vld [vmem:[#allocation6 + $0x30] sm:$0xff]   ;;  %v868_v11 = vld [vmem:[#allocation6 + $0x38] sm:$0xff]   ;;  %s562_s11 = sshll.u32 %s286_s9, 4  ;;  %s549_s17 = scalar_lea.sflag [#allocation5], %s1283_s16  ;;  %s1307_s11 = int_to_ptr.vmem [resolvable:$true] %s562_s11 }
  0x71   : > { %732 = vmatprep.subr.bf16.mxu0 %v1060_v0  ;;  %752 = vmatprep.subr.bf16.mxu1 %v1060_v0  ;;  %v298_v12 = vld [vmem:[%s1287_s27] sm:$0xff]  ;;  %v299_v13 = vld [vmem:[%s1287_s27 + $0x8] sm:$0xff]  ;;  %s965_s15 = scalar_lea.vmem %s1307_s11, 128  ;;  %p1381_p12 = scmp.ne.s32.totalorder %s1377_s8, 0 }
  0x72   : > { %v300_v14 = vpack.c.bf16 %v299_v13, %v298_v12  ;;  %v872_v15 = vld [vmem:[#allocation8 + $0x18] sm:$0xff]   ;;  %v873_v16 = vld [vmem:[#allocation8 + $0x20] sm:$0xff]   ;;  %v874_v17 = vld [vmem:[#allocation8 + $0x28] sm:$0xff]   ;;  %p966_p8 = scmp.ne.s32.totalorder %s1307_s11, %s965_s15  ;;  %s1062_s21 = smov [#allocation9]  }
  0x73   : > { %v875_v18 = vld [vmem:[#allocation8 + $0x30] sm:$0xff]   ;;  %v876_v19 = vld [vmem:[#allocation8 + $0x38] sm:$0xff]   ;;  %v686_v21 = vld [vmem:[%s1363_s2] ss:$0 sm:$0xff]  ;;  %s969_s27 = sshll.u32 %s1062_s21, 4  ;;  %s970_s27 = int_to_ptr.vmem [resolvable:$false] %s969_s27 }
  0x74   : > { %733 = vmatpush3.bf16.msra.mxu0 %v862_v2  ;;  %753 = vmatpush3.bf16.msra.mxu1 %v870_v6  ;;  %v687_v29 = vld [vmem:[%s1365_s4] ss:$0 sm:$0xff]  ;;  %p967_p1 = pnand %p966_p8, %p1381_p12  ;;  %s971_s26 = scalar_lea.vmem %s970_s27, 256 }
  0x75   : > { %734 = vmatprep.subr.bf16.mxu0 %v1060_v0  ;;  %754 = vmatprep.subr.bf16.mxu1 %v1060_v0  ;;  %p972_p3 = scmp.lt.s32.totalorder %s1307_s11, %s970_s27  ;;  %p973_p5 = scmp.lt.s32.totalorder %s971_s26, %s965_s15 }
  0x76   : > { %p968_p10 = pneg %p967_p1 }
  0x77   : > { %p974_p9 = por %p973_p5, %p972_p3 }
  0x78   : > { %735 = vmatpush3.bf16.msra.mxu0 %v863_v3  ;;  %755 = vmatpush3.bf16.msra.mxu1 %v871_v8 }
  0x79   : > { %736 = vmatprep.subr.bf16.mxu0 %v1060_v0  ;;  %756 = vmatprep.subr.bf16.mxu1 %v1060_v0  ;;  %p975_p11 = pnand %p974_p9, %p968_p10 }
  0x7c   : > { %737 = vmatpush3.bf16.msra.mxu0 %v864_v5  ;;  %757 = vmatpush3.bf16.msra.mxu1 %v872_v15 }
  0x7d   : > { %738 = vmatprep.subr.bf16.mxu0 %v1060_v0  ;;  %758 = vmatprep.subr.bf16.mxu1 %v1060_v0 }
  0x80   : > { %739 = vmatpush3.bf16.msra.mxu0 %v865_v7  ;;  %759 = vmatpush3.bf16.msra.mxu1 %v873_v16 }
  0x81   : > { %740 = vmatprep.subr.bf16.mxu0 %v1060_v0  ;;  %760 = vmatprep.subr.bf16.mxu1 %v1060_v0 }
  0x84   : > { %741 = vmatpush3.bf16.msra.mxu0 %v866_v9  ;;  %761 = vmatpush3.bf16.msra.mxu1 %v874_v17 }
  0x85   : > { %742 = vmatprep.subr.bf16.mxu0 %v1060_v0  ;;  %762 = vmatprep.subr.bf16.mxu1 %v1060_v0 }
  0x88   : > { %743 = vmatpush3.bf16.msra.mxu0 %v867_v10  ;;  %763 = vmatpush3.bf16.msra.mxu1 %v875_v18 }
  0x89   : > { %744 = vmatprep.subr.bf16.mxu0 %v1060_v0  ;;  %764 = vmatprep.subr.bf16.mxu1 %v1060_v0 }
  0x8c   : > { %745 = vmatpush3.bf16.msra.mxu0 %v868_v11  ;;  %765 = vmatpush3.bf16.msra.mxu1 %v876_v19 }
  0x8f   : > { %747 = vmatmul.mubr.bf16.vlgmr.msra.gmra.mrb[0].mxu0 %v300_v14 }
 0x162   : > { %v399_v20 = vpop.f32.mrb[0].mxu0 }
 0x163   : > { %v748_v22 = vpop.f32.mrb[1].mxu0  ;;  %v422_v24 = vadd.f32 %v686_v21, %v399_v20 }
 0x164   : > { %v402_v23 = vpop.f32.mrb[2].mxu0 }
 0x165   : > { %v423_v25 = vadd.f32 %v686_v21, %v402_v23  ;;  %v749_v26 = vpop.f32.mrb[3].mxu0 }
 0x167   : > { %v424_v27 = vpack.c.bf16 %v423_v25, %v422_v24 }
 0x169   : > { %877 = vtanh.bf16 %v424_v27 }
 0x174   : > { %v878_v28 = vpop.eup %877 }
 0x175   : > { %767 = vmatmul.mubr.bf16.vlgmr.msra.gmra.mrb[0].mxu1 %v878_v28 }
 0x248   : > { %v531_v30 = vpop.f32.mrb[0].mxu1 }
 0x249   : > { %v768_v31 = vpop.f32.mrb[1].mxu1  ;;  %v532_v33 = vadd.f32 %v687_v29, %v531_v30 }
 0x24a   : > { %v534_v32 = vpop.f32.mrb[2].mxu1 }
 0x24b   : > { %v535_v34 = vadd.f32 %v687_v29, %v534_v32  ;;  %v769_v35 = vpop.f32.mrb[3].mxu1 }
 0x24d   : > { %v710_v36 = vpack.c.bf16 %v535_v34, %v532_v33 }
 0x24f   : > { %711 = vst [vmem:[%s286_s9] sm:$0xff] %v710_v36  }
 0x250   : > { %978 = shalt.err (!%p975_p11)
}
 0x251   : > { %s979_s28 = scalar_lea.hbm %s1312_s25, 128  ;;  %s983_s7 = scalar_lea.hbm %s1366_s5, 256 }
 0x252   : > { %p980_p0 = scmp.ne.s32.totalorder %s1312_s25, %s979_s28  ;;  %p984_p6 = scmp.lt.u32.totalorder %s1312_s25, %s1366_s5 }
 0x253   : > { %p985_p7 = scmp.lt.u32.totalorder %s983_s7, %s979_s28  ;;  %p987_p8 = scmp.lt.u32.totalorder %s979_s28, %s1312_s25 }
 0x254   : > { %p981_p4 = pnand %p980_p0, %p1381_p12 }
 0x255   : > { %p986_p2 = por %p985_p7, %p984_p6 }
 0x256   : > { %p982_p13 = pneg %p981_p4 }
 0x257   : > { %p988_p1 = por %p987_p8, %p986_p2 }
 0x259   : > { %p989_p10 = pnand %p988_p1, %p982_p13 }
 0x25b   : > { %992 = shalt.err (!%p989_p10)
}
 0x25c   : > { %s1063_s10 = smov 64   ;;  %s1064_s13 = smov 4  }
 0x25d   : > { %780 = dma.vmem_to_hbm [thread:$0]  (%p1381_p12), %s1307_s11, 128, %s1312_s25, %s549_s17, %s1063_s10, %s1063_s10, %s1064_s13  }
 0x25e PF: > { %s577_s15 = sand.u32 1, %s1031_s18   ;;  %p1382_p3 = scmp.ne.s32.totalorder %s1374_s29, 0 }
 0x25f   : > { %p1383_p5 = scmp.ge.s32.totalorder %s1051_s23, 2  ;;  %s578_s21 = scalar_lea.sflag [#allocation5], %s577_s15 }
 0x261   : > { %p794_p9 = pnand %p1383_p5, %p1382_p3 }
 0x263   : > { %1026 = dma.done.wait (!%p794_p9), %s578_s21, 128  }
 0x264   : > { %1028 = vsyncadd (!%p794_p9), %s578_s21, 4294967168  ;;  %s22_s23 = sadd.s32 1, %s1051_s23   ;;  %s1384_s18 = smov %s1035_s19 }
 0x265   : > { %p19_p11 = scmp.ge.s32.totalorder %s22_s23, 4   ;;  %s1385_s19 = smov %s1039_s20 }
 0x266   : > { %s1386_s20 = smov %s1237_s6  ;;  %s1387_s21 = smov %s1047_s22 }
 0x267   : > { %s1388_s22 = smov %s1390_s12  ;;  %21 = sbr.rel (!%p19_p11) target bundleno = 7 (0x7), region = 101 }
 0x26e   :  { %583 = vsyncpa [#allocation4], 1 }
 0x26f   :  { %585 = vsyncpa [#allocation4 + $0x1], 1 }
 0x270   :  { %586 = vsyncpa [#allocation7], 1 }
 0x271   :  { %587 = vsyncpa [#allocation5], 1 }
 0x272   :  { %589 = vsyncpa [#allocation5 + $0x1], 1 }

</bundles_post_ra>
